<compile_context>
chip_gen: v7x
topology: tpu7x:2x2x1
jax: 0.10.0
libtpu: 0.0.40
codegen_flags: <defaults>
</compile_context>

<pallas_src>
import jax
import jax.numpy as jnp
from jax.experimental import pallas as pl
from jax.experimental.pallas import tpu as pltpu


def _relu_kernel(x_ref, o_ref):
    # Elementwise ReLU on the current (TM, W) VMEM tile (one vmax per vreg,
    # VPU path).  NOTE: the last grid block may be ragged -- reads of the
    # padded region are garbage and out-of-bounds writes are masked, which is
    # only safe because this kernel is purely elementwise.  Do NOT add
    # reductions or cross-row terms here without masking the ragged region.
    x = x_ref[...]
    o_ref[...] = jnp.maximum(x, jnp.zeros((), x.dtype))


def _round_up(a, m):
    return ((a + m - 1) // m) * m


def _tpu_config():
    """Return (tile_bytes, n_tensorcores) tuned per TPU generation."""
    kind = ""
    try:
        dev = jax.devices()[0]
        if dev.platform == "tpu":
            kind = dev.device_kind.lower()
    except Exception:
        pass
    is_v7 = "7" in kind
    megacore = is_v7 or ("v4" in kind) or ("v5p" in kind)
    # v7x: 8 MiB blocks (4 buffers = 32 MiB, fits its 64 MiB VMEM); v5e/v6e
    # keep 4 MiB blocks (already near roofline, and avoids VMEM bloat).
    tile_bytes = (8 << 20) if is_v7 else (4 << 20)
    return tile_bytes, (2 if megacore else 1)


def _choose_tile_rows(rows, width, itemsize, tile_bytes, n_cores):
    # dtype-aware sublane multiple: 8 f32 / 16 bf16-fp16 / 32 int8-fp8.
    sub_mult = 8 * max(1, 4 // itemsize)
    tm_max = max(sub_mult, (tile_bytes // (width * itemsize)) // sub_mult * sub_mult)
    steps = pl.cdiv(rows, tm_max)
    if n_cores > 1 and rows >= n_cores * sub_mult:
        # Even number of steps so the 1-D "parallel" grid axis shards across
        # both TensorCores on megacore chips (v7x / v4 / v5p).
        steps = _round_up(max(steps, n_cores), n_cores)
    # Split rows evenly across the chosen steps so the tail block is not a
    # near-empty step that still pays the full ~600-cycle grid overhead.
    tm = min(rows, _round_up(pl.cdiv(rows, steps), sub_mult))
    return tm


def _relu_2d(x2d, *, donate=False):
    rows, width = x2d.shape
    dtype = x2d.dtype
    itemsize = jnp.dtype(dtype).itemsize
    tile_bytes, n_cores = _tpu_config()
    tm = _choose_tile_rows(rows, width, itemsize, tile_bytes, n_cores)
    grid = (pl.cdiv(rows, tm),)

    # Scoped-VMEM limit derived from the actual footprint: (in + out), each
    # double-buffered, = 4 tiles, plus headroom.  Clamped to stay sane on
    # v7x's 64 MiB physical VMEM.
    vmem_limit = int(min(max(8 << 20, 4 * tm * width * itemsize + (2 << 20)), 64 << 20))

    return pl.pallas_call(
        _relu_kernel,
        out_shape=jax.ShapeDtypeStruct((rows, width), dtype),
        grid_spec=pltpu.PrefetchScalarGridSpec(
            num_scalar_prefetch=0,
            grid=grid,
            in_specs=[pl.BlockSpec((tm, width), lambda i: (i, 0))],
            out_specs=pl.BlockSpec((tm, width), lambda i: (i, 0)),
        ),
        compiler_params=pltpu.CompilerParams(
            dimension_semantics=("parallel",),
            vmem_limit_bytes=vmem_limit,
        ),
        cost_estimate=pl.CostEstimate(
            flops=rows * width,
            transcendentals=0,
            bytes_accessed=2 * rows * width * itemsize,
        ),
        input_output_aliases=({0: 0} if donate else {}),
    )(x2d)


def ged_relu_forward(x, S_n=None, S_p=None, l=0.01, k=1, p=1.0, donate_input=False):
    """Forward of GEDReLU: ReLU(x). S_n/S_p/l/k/p only matter for backward."""
    orig_shape = x.shape
    total = x.size

    # Lane-aligned prefix (multiple of 128); the <128-element tail (if any) is
    # handled outside the kernel so awkward sizes don't pay pad + un-pad HBM
    # round trips.
    main = (total // 128) * 128
    if main == 0:
        # Tiny input (< 128 elements): a kernel launch is not worth it.
        return jnp.maximum(x, jnp.zeros((), x.dtype))

    width = 128
    for w in (1024, 512, 256):
        if main % w == 0:
            width = w
            break
    rows = main // width

    x_flat = x.reshape(-1)
    x_main = x_flat if main == total else x_flat[:main]
    out_main = _relu_2d(x_main.reshape(rows, width), donate=donate_input)

    if main == total:
        # Common case: reshape is metadata-only, zero extra HBM traffic.
        return out_main.reshape(orig_shape)
    tail = jnp.maximum(x_flat[main:], jnp.zeros((), x.dtype))
    return jnp.concatenate([out_main.reshape(-1), tail]).reshape(orig_shape)


if __name__ == "__main__":
    key = jax.random.PRNGKey(0)
    # Small NCHW-style input consistent with a conv activation.
    x = jax.random.normal(key, (2, 4, 16, 16), dtype=jnp.float32)

    # Parameters as the module lazily creates them: zeros of input.shape[1:].
    S_n = jnp.zeros(x.shape[1:], dtype=x.dtype)
    S_p = jnp.zeros(x.shape[1:], dtype=x.dtype)

    fwd = jax.jit(ged_relu_forward)
    out = jax.block_until_ready(fwd(x, S_n, S_p))

    # Sanity check against pure-JAX reference (forward == ReLU).
    ref = jnp.maximum(x, 0.0)
    assert out.shape == x.shape and out.dtype == x.dtype
    assert bool(jnp.allclose(out, ref)), "mismatch vs ReLU reference (main path)"

    # Exercise the awkward-size path (lane-aligned prefix + tiny tail).
    x2 = jax.random.normal(jax.random.PRNGKey(1), (2, 3, 67), dtype=jnp.float32)
    out2 = jax.block_until_ready(jax.jit(ged_relu_forward)(x2))
    assert bool(jnp.allclose(out2, jnp.maximum(x2, 0.0))), "mismatch (tail path)"

    print("KERNEL_OK")
</pallas_src>

<mosaic_0001>
module attributes {stable_mosaic.version = 11 : i64} {
  func.func @_relu_kernel(%arg0: i32, %arg1: memref<2x1024xf32, #tpu.memory_space<vmem>>, %arg2: memref<2x1024xf32, #tpu.memory_space<vmem>>) attributes {dimension_semantics = [#tpu.dimension_semantics<parallel>], iteration_bounds = array<i64: 1>, scalar_prefetch = 0 : i64, scratch_operands = 0 : i64, tpu.core_type = #tpu.core_type<tc>, window_params = [{transform_indices = @transform_0, window_bounds = array<i64: 2, 1024>}, {transform_indices = @transform_1, window_bounds = array<i64: 2, 1024>}]} {
    %c0 = arith.constant 0 : index
    %c0_0 = arith.constant 0 : index
    %0 = vector.load %arg1[%c0, %c0_0] : memref<2x1024xf32, #tpu.memory_space<vmem>>, vector<2x1024xf32>
    %cst = arith.constant 0.000000e+00 : f32
    %1 = vector.broadcast %cst : f32 to vector<2x1024xf32>
    %2 = arith.maximumf %0, %1 : vector<2x1024xf32>
    %c0_1 = arith.constant 0 : index
    %c0_2 = arith.constant 0 : index
    %3 = vector.load %arg2[%c0_1, %c0_2] : memref<2x1024xf32, #tpu.memory_space<vmem>>, vector<2x1024xf32>
    tpu.vector_store %arg2[%c0_1, %c0_2], %2 {strides = array<i32>} : memref<2x1024xf32, #tpu.memory_space<vmem>>, vector<2x1024xf32>,
    return
  }
  func.func @transform_0(%arg0: i32) -> (i32, i32) {
    %c0_i32 = arith.constant 0 : i32
    %c0_i32_0 = arith.constant 0 : i32
    return %arg0, %c0_i32 : i32, i32
  }
  func.func @transform_1(%arg0: i32) -> (i32, i32) {
    %c0_i32 = arith.constant 0 : i32
    %c0_i32_0 = arith.constant 0 : i32
    return %arg0, %c0_i32 : i32, i32
  }
}

</mosaic_0001>

<bundles_post_ra>
// kernel: ged_relu_forward.1
= control target key start
LH: loop header
LB: loop body
LE: loop exit
PB: predicated region body
PF: predicated region fallthrough
CT: control target
= control target key end

     0   :  { %s40_s0 = inlined_call_operand.vmem [shape: f32[2,1024], index: 0, kind: input, shape index: {}]   ;;  %s41_s1 = inlined_call_operand.vmem [shape: f32[2,1024], index: 1, kind: output, shape index: {}]  }
   0x1   :  { %v8_v0 = vld [vmem:[%s40_s0] sm:$0xff]  ;;  %v9_v1 = vld [vmem:[%s40_s0 + $0x8] sm:$0xff] }
   0x2   :  { %v10_v2 = vmax.f32 %v8_v0, 0.0  ;;  %v11_v3 = vmax.f32 %v9_v1, 0.0 }
   0x4   :  { %12 = vst [vmem:[%s41_s1] sm:$0xff] %v10_v2  ;;  %13 = vst [vmem:[%s41_s1 + $0x8] sm:$0xff] %v11_v3 }

</bundles_post_ra>
